<compile_context>
chip_gen: v7x
topology: tpu7x:2x2x1
jax: 0.10.0
libtpu: 0.0.40
codegen_flags: <defaults>
</compile_context>

<pallas_src>
import functools

import jax
import jax.numpy as jnp
from jax.experimental import pallas as pl
from jax.experimental.pallas import tpu as pltpu

EPS = 1e-5  # nn.BatchNorm1d default eps


def _round_up(v, m):
    return (v + m - 1) // m * m


def _device_kind():
    try:
        return jax.devices()[0].device_kind.lower()
    except Exception:
        return ""


def _transition_kernel(x_ref, wt_ref, p_ref, o_ref, *, apply_norm, n_real):
    """One output-feature tile: z = x @ Wt_tile (+bias), BN over batch, ReLU.

    p_ref holds the stacked per-feature params:
      row 0 = linear bias, row 1 = BN gamma, row 2 = BN beta.
    """
    x = x_ref[...]                                     # (N_pad, D_in_pad) bf16
    wt = wt_ref[...]                                   # (D_in_pad, TILE)  bf16
    p = p_ref[...]                                     # (3, TILE)         f32

    # Linear (MXU, f32 accumulation).
    z = jnp.dot(x, wt, preferred_element_type=jnp.float32)   # (N_pad, TILE)

    if apply_norm:
        # Linear bias is cancelled exactly by mean subtraction -> never added
        # here.  Padded x rows are zero => padded z rows are exactly zero, so
        # use unmasked sums with a tiny per-column correction for the padded
        # rows instead of iota/compare/mask multiplies.
        n_pad = z.shape[0]
        inv_n = 1.0 / float(n_real)
        mean = jnp.sum(z, axis=0, keepdims=True) * inv_n            # (1, TILE)
        diff = z - mean
        pad_rows = float(n_pad - n_real)
        var = (jnp.sum(diff * diff, axis=0, keepdims=True)
               - pad_rows * (mean * mean)) * inv_n
        z = diff * jax.lax.rsqrt(var + EPS)
        z = z * p[1:2, :] + p[2:3, :]                  # gamma, beta
    else:
        z = z + p[0:1, :]                              # bias (no-BN path, N==1)

    # ReLU; padded rows/cols are sliced off (or already zero) outside.
    o_ref[...] = jnp.maximum(z, 0.0).astype(o_ref.dtype)


def prepare_transition_params(w, b, gamma, beta, *, compute_dtype=jnp.bfloat16):
    """One-time (per weight update) preprocessing: transpose, pad, cast, stack.

    Cache and reuse the returned dict across forward calls so the per-call
    path never repays the DxD transpose + pad HBM round trip.
    """
    d_out, d_in = w.shape  # PyTorch nn.Linear layout: (out_features, in_features)

    kind = _device_kind()
    is_v5e = ("v5 lite" in kind) or ("v5e" in kind)
    is_v7 = "v7" in kind

    # v6e/v7x MXU is 2x256x256 -> keep output features (and tiles) >= 256 wide.
    feat_align = 128 if is_v5e else 256
    din_pad = _round_up(d_in, 128)
    dout_pad = _round_up(d_out, feat_align)

    cands = (512, 256, 128) if is_v5e else (512, 256)
    tile = None
    if is_v7:
        # Prefer an even number of tiles so the "parallel" grid axis splits
        # evenly across v7x's two TensorCores.
        for c in cands:
            if dout_pad % c == 0 and (dout_pad // c) % 2 == 0:
                tile = c
                break
        if tile is None:
            for c in cands:
                if dout_pad % c == 0 and dout_pad // c >= 2:
                    tile = c
                    break
    if tile is None:
        for c in cands:
            if dout_pad % c == 0:
                tile = c
                break
    if tile is None:
        tile = 128

    # Pre-transposed, padded, bf16-cast weight (zero padding: zero input cols
    # contribute nothing; zero output cols only see themselves in BN and are
    # sliced away).
    wt_p = jnp.zeros((din_pad, dout_pad), compute_dtype).at[:d_in, :d_out].set(
        w.T.astype(compute_dtype))

    # Stack bias / gamma / beta -> one DMA stream per grid step.
    params = jnp.zeros((3, dout_pad), jnp.float32)
    params = params.at[0, :d_out].set(b.astype(jnp.float32))
    params = params.at[1, :d_out].set(gamma.astype(jnp.float32))
    params = params.at[2, :d_out].set(beta.astype(jnp.float32))

    return dict(wt_p=wt_p, params=params, d_in=d_in, d_out=d_out,
                din_pad=din_pad, dout_pad=dout_pad, tile=tile,
                compute_dtype=compute_dtype, is_v7=is_v7, is_v5e=is_v5e)


def _vmem_limit_bytes(n_pad, din_pad, dout_pad, tile, compute_dtype, out_dtype,
                      is_v7):
    cb = jnp.dtype(compute_dtype).itemsize
    ob = jnp.dtype(out_dtype).itemsize
    need = (n_pad * din_pad * cb           # x: resident, single-buffered
            + 2 * din_pad * tile * cb      # weight tile: double-buffered
            + 2 * n_pad * tile * ob        # output tile: double-buffered
            + 2 * 8 * tile * 4)            # stacked params (sublane-padded)
    limit = int(need * 1.5) + (4 << 20)    # Mosaic internal-scratch headroom
    cap = (56 << 20) if is_v7 else (100 << 20)  # v7x has only 64 MiB physical
    return max(16 << 20, min(limit, cap))


def transition_block_apply(x, prep, *, out_dtype=jnp.float32):
    """x: (N, D) float32 (or castable). Returns (N, D) in out_dtype."""
    n, d_in = x.shape
    assert d_in == prep["d_in"]
    compute_dtype = prep["compute_dtype"]
    din_pad, dout_pad, tile = prep["din_pad"], prep["dout_pad"], prep["tile"]
    d_out = prep["d_out"]

    # bf16 packs 16 rows per vreg -> round batch to 16 (8 for 32-bit inputs).
    row_align = 16 if jnp.dtype(compute_dtype).itemsize == 2 else 8
    n_pad = _round_up(max(n, row_align), row_align)

    x_p = x.astype(compute_dtype)
    if (n_pad, din_pad) != (n, d_in):
        x_p = jnp.zeros((n_pad, din_pad), compute_dtype).at[:n, :d_in].set(x_p)

    num_tiles = dout_pad // tile
    kernel = functools.partial(
        _transition_kernel,
        apply_norm=(n > 1),   # mirrors `z.shape[0] > 1` (static in JAX)
        n_real=n,
    )

    out_padded = pl.pallas_call(
        kernel,
        out_shape=jax.ShapeDtypeStruct((n_pad, dout_pad), out_dtype),
        grid_spec=pltpu.PrefetchScalarGridSpec(
            num_scalar_prefetch=0,
            grid=(num_tiles,),
            in_specs=[
                # x never changes across the grid: single-buffer it (halves the
                # largest VMEM allocation).
                pl.BlockSpec((n_pad, din_pad), lambda j: (0, 0),
                             pipeline_mode=pl.Buffered(1)),
                pl.BlockSpec((din_pad, tile), lambda j: (0, j)),   # Wt column tile
                pl.BlockSpec((3, tile), lambda j: (0, j)),         # bias/gamma/beta
            ],
            out_specs=pl.BlockSpec((n_pad, tile), lambda j: (0, j)),
        ),
        compiler_params=pltpu.CompilerParams(
            dimension_semantics=("parallel",),   # megacore split on v7x
            vmem_limit_bytes=_vmem_limit_bytes(
                n_pad, din_pad, dout_pad, tile, compute_dtype, out_dtype,
                prep["is_v7"]),
        ),
    )(x_p, prep["wt_p"], prep["params"])

    if (n_pad, dout_pad) == (n, d_out):
        return out_padded            # no trailing slice copy needed
    return out_padded[:n, :d_out]
    # TODO(synk): for very large N (resident x no longer fits VMEM beside a
    # weight tile — ~2x sooner on v7x's 64 MiB), add an M grid axis with
    # per-tile sum / sum-of-squares VMEM accumulators and finalize BN+ReLU on
    # the last M step ("arbitrary" axis).
    # TODO(synk): optional int8 weight streaming (per-column scales folded
    # into gamma) for v5e/v6e when the accuracy budget allows.


def transition_block(x, w, b, gamma, beta, **kw):
    """One-shot convenience wrapper (prep is not cached)."""
    return transition_block_apply(x, prepare_transition_params(w, b, gamma, beta), **kw)


def reference(x, w, b, gamma, beta):
    z = x @ w.T + b
    if x.shape[0] > 1:
        mean = jnp.mean(z, axis=0, keepdims=True)
        var = jnp.mean((z - mean) ** 2, axis=0, keepdims=True)
        z = (z - mean) / jnp.sqrt(var + EPS) * gamma + beta
    return jnp.maximum(z, 0.0)


if __name__ == "__main__":
    N, D = 8, 32

    key = jax.random.PRNGKey(0)
    kx, kw, kb = jax.random.split(key, 3)

    x = jax.random.normal(kx, (N, D), dtype=jnp.float32)

    # Deterministic params matching nn.Linear(dim, dim) + BatchNorm1d(dim) init.
    bound = 1.0 / jnp.sqrt(D)
    w = jax.random.uniform(kw, (D, D), minval=-bound, maxval=bound, dtype=jnp.float32)
    b = jax.random.uniform(kb, (D,), minval=-bound, maxval=bound, dtype=jnp.float32)
    gamma = jnp.ones((D,), dtype=jnp.float32)
    beta = jnp.zeros((D,), dtype=jnp.float32)

    # Weight prep is done once (cache this across steps); the per-call path
    # only pads/casts x.
    prep = prepare_transition_params(w, b, gamma, beta)
    out = transition_block_apply(x, prep)
    jax.block_until_ready(out)

    ref = reference(x, w, b, gamma, beta)
    assert out.shape == (N, D)
    # Tolerance reflects bf16 matmul inputs (f32 accumulation + f32 BN/ReLU).
    assert jnp.allclose(out, ref, atol=5e-2, rtol=5e-2), "mismatch vs reference"

    print("KERNEL_OK")
</pallas_src>

<mosaic_0001>
module attributes {stable_mosaic.version = 11 : i64} {
  func.func @_transition_kernel(%arg0: i32, %arg1: memref<16x128xbf16, #tpu.memory_space<vmem>>, %arg2: memref<128x256xbf16, #tpu.memory_space<vmem>>, %arg3: memref<3x256xf32, #tpu.memory_space<vmem>>, %arg4: memref<16x256xf32, #tpu.memory_space<vmem>>) attributes {dimension_semantics = [#tpu.dimension_semantics<parallel>], iteration_bounds = array<i64: 1>, scalar_prefetch = 0 : i64, scratch_operands = 0 : i64, tpu.core_type = #tpu.core_type<tc>, window_params = [{pipeline_mode = #tpu.pipeline_mode<synchronous>, transform_indices = @transform_0, window_bounds = array<i64: 16, 128>}, {transform_indices = @transform_1, window_bounds = array<i64: 128, 256>}, {transform_indices = @transform_2, window_bounds = array<i64: 3, 256>}, {transform_indices = @transform_3, window_bounds = array<i64: 16, 256>}]} {
    %c0 = arith.constant 0 : index
    %c0_0 = arith.constant 0 : index
    %0 = vector.load %arg1[%c0, %c0_0] : memref<16x128xbf16, #tpu.memory_space<vmem>>, vector<16x128xbf16>
    %c0_1 = arith.constant 0 : index
    %c0_2 = arith.constant 0 : index
    %1 = vector.load %arg2[%c0_1, %c0_2] : memref<128x256xbf16, #tpu.memory_space<vmem>>, vector<128x256xbf16>
    %c0_3 = arith.constant 0 : index
    %c0_4 = arith.constant 0 : index
    %2 = vector.load %arg3[%c0_3, %c0_4] : memref<3x256xf32, #tpu.memory_space<vmem>>, vector<3x256xf32>
    %cst = arith.constant dense<0.000000e+00> : vector<16x256xf32>
    %3 = tpu.matmul %0, %1, %cst {dimension_numbers = #tpu.dot_dimension_numbers<[1], [0], [0], [1], [0, 0, 1, 1], [], []>} : vector<16x128xbf16>, vector<128x256xbf16>, vector<16x256xf32> -> vector<16x256xf32>
    %cst_5 = arith.constant dense<0.000000e+00> : vector<256xf32>
    %4 = vector.multi_reduction <add>, %3, %cst_5 [0] : vector<16x256xf32> to vector<256xf32>
    %5 = vector.shape_cast %4 : vector<256xf32> to vector<1x256xf32>
    %cst_6 = arith.constant 1.250000e-01 : f32
    %6 = vector.broadcast %cst_6 : f32 to vector<1x256xf32>
    %7 = arith.mulf %5, %6 : vector<1x256xf32>
    %8 = vector.broadcast %7 : vector<1x256xf32> to vector<16x256xf32>
    %9 = arith.subf %3, %8 : vector<16x256xf32>
    %10 = arith.mulf %9, %9 : vector<16x256xf32>
    %cst_7 = arith.constant dense<0.000000e+00> : vector<256xf32>
    %11 = vector.multi_reduction <add>, %10, %cst_7 [0] : vector<16x256xf32> to vector<256xf32>
    %12 = vector.shape_cast %11 : vector<256xf32> to vector<1x256xf32>
    %13 = arith.mulf %7, %7 : vector<1x256xf32>
    %cst_8 = arith.constant 8.000000e+00 : f32
    %14 = vector.broadcast %cst_8 : f32 to vector<1x256xf32>
    %15 = arith.mulf %14, %13 : vector<1x256xf32>
    %16 = arith.subf %12, %15 : vector<1x256xf32>
    %cst_9 = arith.constant 1.250000e-01 : f32
    %17 = vector.broadcast %cst_9 : f32 to vector<1x256xf32>
    %18 = arith.mulf %16, %17 : vector<1x256xf32>
    %cst_10 = arith.constant 9.99999974E-6 : f32
    %19 = vector.broadcast %cst_10 : f32 to vector<1x256xf32>
    %20 = arith.addf %18, %19 : vector<1x256xf32>
    %21 = math.rsqrt %20 : vector<1x256xf32>
    %22 = vector.broadcast %21 : vector<1x256xf32> to vector<16x256xf32>
    %23 = arith.mulf %9, %22 : vector<16x256xf32>
    %24 = vector.extract_strided_slice %2 {offsets = [1, 0], sizes = [1, 256], strides = [1, 1]} : vector<3x256xf32> to vector<1x256xf32>
    %25 = vector.broadcast %24 : vector<1x256xf32> to vector<16x256xf32>
    %26 = arith.mulf %23, %25 : vector<16x256xf32>
    %27 = vector.extract_strided_slice %2 {offsets = [2, 0], sizes = [1, 256], strides = [1, 1]} : vector<3x256xf32> to vector<1x256xf32>
    %28 = vector.broadcast %27 : vector<1x256xf32> to vector<16x256xf32>
    %29 = arith.addf %26, %28 : vector<16x256xf32>
    %cst_11 = arith.constant 0.000000e+00 : f32
    %30 = vector.broadcast %cst_11 : f32 to vector<16x256xf32>
    %31 = arith.maximumf %29, %30 : vector<16x256xf32>
    %c0_12 = arith.constant 0 : index
    %c0_13 = arith.constant 0 : index
    %32 = vector.load %arg4[%c0_12, %c0_13] : memref<16x256xf32, #tpu.memory_space<vmem>>, vector<16x256xf32>
    tpu.vector_store %arg4[%c0_12, %c0_13], %31 {strides = array<i32>} : memref<16x256xf32, #tpu.memory_space<vmem>>, vector<16x256xf32>,
    return
  }
  func.func @transform_0(%arg0: i32) -> (i32, i32) {
    %c0_i32 = arith.constant 0 : i32
    %c0_i32_0 = arith.constant 0 : i32
    %c0_i32_1 = arith.constant 0 : i32
    return %c0_i32, %c0_i32_0 : i32, i32
  }
  func.func @transform_1(%arg0: i32) -> (i32, i32) {
    %c0_i32 = arith.constant 0 : i32
    %c0_i32_0 = arith.constant 0 : i32
    return %c0_i32, %arg0 : i32, i32
  }
  func.func @transform_2(%arg0: i32) -> (i32, i32) {
    %c0_i32 = arith.constant 0 : i32
    %c0_i32_0 = arith.constant 0 : i32
    return %c0_i32, %arg0 : i32, i32
  }
  func.func @transform_3(%arg0: i32) -> (i32, i32) {
    %c0_i32 = arith.constant 0 : i32
    %c0_i32_0 = arith.constant 0 : i32
    return %c0_i32, %arg0 : i32, i32
  }
}

</mosaic_0001>

<bundles_post_ra>
// kernel: tpu_custom_call.1
= control target key start
LH: loop header
LB: loop body
LE: loop exit
PB: predicated region body
PF: predicated region fallthrough
CT: control target
= control target key end

     0   :  { %8 = vsyncpa [#allocation3], 0  ;;  %s558_s0 = inlined_call_operand.hbm [shape: bf16[16,128], index: 0, kind: input, shape index: {}]   ;;  %s559_s1 = inlined_call_operand.hbm [shape: bf16[128,256], index: 1, kind: input, shape index: {}]   ;;  %s560_s2 = inlined_call_operand.hbm [shape: f32[3,256], index: 2, kind: input, shape index: {}]   ;;  %s561_s3 = inlined_call_operand.hbm [shape: f32[16,256], index: 3, kind: output, shape index: {}]  }
   0x1   :  { %9 = vsyncpa [#allocation6], 0 }
   0x2   :  { %10 = vsyncpa [#allocation4], 0  ;;  %s479_s12 = smov [#allocation5]   ;;  %s385_s16 = scalar_lea.hbm %s559_s1, 2048 }
   0x3   :  { %s28_s13 = sshll.u32 %s479_s12, 4  ;;  %p386_p0 = scmp.ne.s32.totalorder %s559_s1, %s385_s16  ;;  %s29_s13 = int_to_ptr.vmem [resolvable:$true] %s28_s13 }
   0x4   :  { %p389_p1 = scmp.lt.u32.totalorder %s385_s16, %s559_s1 }
   0x6   :  { %p391_p2 = pnand %p389_p1, %p386_p0 }
   0x8   :  { %394 = shalt.err (!%p391_p2)
}
   0x9   :  { %s395_s21 = scalar_lea.vmem %s29_s13, 2048  ;;  %p400_p4 = scmp.lt.s32.totalorder %s29_s13, %s29_s13 }
   0xa   :  { %p396_p3 = scmp.ne.s32.totalorder %s29_s13, %s395_s21  ;;  %p401_p5 = scmp.lt.s32.totalorder %s395_s21, %s395_s21 }
   0xc   :  { %p402_p6 = por %p401_p5, %p400_p4 }
   0xe   :  { %p403_p7 = pnand %p402_p6, %p396_p3 }
  0x10   :  { %406 = shalt.err (!%p403_p7)
}
  0x11   :  { %s480_s22 = smov 128   ;;  %s481_s23 = smov 8  }
  0x12   :  { %34 = dma.hbm_to_vmem [thread:$0]  %s559_s1, 2048, %s29_s13, [#allocation6], %s480_s22, %s480_s22, %s481_s23  }
  0x13   :  { %s482_s26 = smov [#allocation2]   ;;  %s407_s30 = scalar_lea.hbm %s558_s0, 128 }
  0x14   :  { %s16_s27 = sshll.u32 %s482_s26, 4  ;;  %p408_p8 = scmp.ne.s32.totalorder %s558_s0, %s407_s30  ;;  %s17_s27 = int_to_ptr.vmem [resolvable:$true] %s16_s27 }
  0x15   :  { %p411_p9 = scmp.lt.u32.totalorder %s407_s30, %s558_s0 }
  0x17   :  { %p413_p10 = pnand %p411_p9, %p408_p8 }
  0x19   :  { %416 = shalt.err (!%p413_p10)
}
  0x1a   :  { %s417_s8 = scalar_lea.vmem %s17_s27, 128  ;;  %p422_p12 = scmp.lt.s32.totalorder %s17_s27, %s17_s27 }
  0x1b   :  { %p418_p11 = scmp.ne.s32.totalorder %s17_s27, %s417_s8  ;;  %p423_p13 = scmp.lt.s32.totalorder %s417_s8, %s417_s8 }
  0x1d   :  { %p424_p0 = por %p423_p13, %p422_p12 }
  0x1f   :  { %p425_p1 = pnand %p424_p0, %p418_p11 }
  0x21   :  { %428 = shalt.err (!%p425_p1)
}
  0x22   :  { %s483_s1 = smov 64   ;;  %s484_s9 = smov 4  }
  0x23   :  { %22 = dma.hbm_to_vmem [thread:$0]  %s558_s0, 128, %s17_s27, [#allocation3], %s483_s1, %s483_s1, %s484_s9  }
  0x24   :  { %s485_s12 = smov [#allocation7]   ;;  %s429_s16 = scalar_lea.hbm %s560_s2, 128 }
  0x25   :  { %s41_s13 = sshll.u32 %s485_s12, 4  ;;  %p430_p2 = scmp.ne.s32.totalorder %s560_s2, %s429_s16  ;;  %s42_s13 = int_to_ptr.vmem [resolvable:$true] %s41_s13 }
  0x26   :  { %p433_p3 = scmp.lt.u32.totalorder %s429_s16, %s560_s2 }
  0x28   :  { %p435_p4 = pnand %p433_p3, %p430_p2 }
  0x2a   :  { %438 = shalt.err (!%p435_p4)
}
  0x2b   :  { %s439_s21 = scalar_lea.vmem %s42_s13, 128  ;;  %p444_p6 = scmp.lt.s32.totalorder %s42_s13, %s42_s13 }
  0x2c   :  { %p440_p5 = scmp.ne.s32.totalorder %s42_s13, %s439_s21  ;;  %p445_p7 = scmp.lt.s32.totalorder %s439_s21, %s439_s21 }
  0x2e   :  { %p446_p8 = por %p445_p7, %p444_p6 }
  0x30   :  { %p447_p9 = pnand %p446_p8, %p440_p5 }
  0x32   :  { %450 = shalt.err (!%p447_p9)
}
  0x33   :  { %44 = dma.hbm_to_vmem [thread:$0]  %s560_s2, 128, %s42_s13, [#allocation6]  }
  0x34   :  { %473 = dma.done.wait [#allocation3], 128  }
  0x35   :  { %474 = vsyncadd [#allocation3], 4294967168 }
  0x36   :  { %475 = dma.done.wait [#allocation6], 2176  }
  0x37   :  { %476 = vsyncadd [#allocation6], 4294965120  ;;  %v486_v0 = vmov 0   ;;  %v356_v1 = vld [vmem:[#allocation5 + $0x4] ss:$8 sps:$4 sm:$0xff]   ;;  %v380_v17 = vld [vmem:[#allocation2] sm:$0xff]   ;;  %v258_v62 = vlaneseq }
  0x38   :  { %192 = vmatprep.mubr.bf16.mxu0 %v486_v0  ;;  %v358_v2 = vld [vmem:[#allocation5] ss:$8 sps:$4 sm:$0xff]   ;;  %160 = vmatprep.subr.bf16.mxu0 %v356_v1  ;;  %v359_v3 = vld [vmem:[#allocation5 + $0x14] ss:$8 sps:$4 sm:$0xff]   ;;  %v361_v4 = vld [vmem:[#allocation5 + $0x10] ss:$8 sps:$4 sm:$0xff]  }
  0x39   :  { %161 = vmatpush1.bf16.msra.mxu0 %v358_v2  ;;  %v362_v5 = vld [vmem:[#allocation5 + $0x24] ss:$8 sps:$4 sm:$0xff]   ;;  %v364_v6 = vld [vmem:[#allocation5 + $0x20] ss:$8 sps:$4 sm:$0xff]   ;;  %v365_v7 = vld [vmem:[#allocation5 + $0x34] ss:$8 sps:$4 sm:$0xff]  }
  0x3a   :  { %162 = vmatprep.subr.bf16.mxu0 %v359_v3  ;;  %v367_v8 = vld [vmem:[#allocation5 + $0x30] ss:$8 sps:$4 sm:$0xff]   ;;  %v368_v9 = vld [vmem:[#allocation5 + $0x44] ss:$8 sps:$4 sm:$0xff]   ;;  %v370_v10 = vld [vmem:[#allocation5 + $0x40] ss:$8 sps:$4 sm:$0xff]  }
  0x3b   :  { %v371_v11 = vld [vmem:[#allocation5 + $0x54] ss:$8 sps:$4 sm:$0xff]   ;;  %v373_v12 = vld [vmem:[#allocation5 + $0x50] ss:$8 sps:$4 sm:$0xff]   ;;  %v374_v13 = vld [vmem:[#allocation5 + $0x64] ss:$8 sps:$4 sm:$0xff]  }
  0x3c   :  { %v376_v14 = vld [vmem:[#allocation5 + $0x60] ss:$8 sps:$4 sm:$0xff]   ;;  %v377_v15 = vld [vmem:[#allocation5 + $0x74] ss:$8 sps:$4 sm:$0xff]   ;;  %v379_v16 = vld [vmem:[#allocation5 + $0x70] ss:$8 sps:$4 sm:$0xff]  }
  0x3d   :  { %163 = vmatpush1.bf16.msra.mxu0 %v361_v4  ;;  %v259_v4 = vshrl.u32 %v258_v62, 7  ;;  %s487_s2 = smov [#allocation8]  }
  0x3e   :  { %164 = vmatprep.subr.bf16.mxu0 %v362_v5  ;;  %s315_s23 = sshll.u32 %s487_s2, 4  ;;  %s316_s23 = int_to_ptr.vmem [resolvable:$true] %s315_s23 }
  0x3f   :  { %s451_s24 = scalar_lea.vmem %s316_s23, 512  ;;  %p456_p11 = scmp.lt.s32.totalorder %s316_s23, %s316_s23 }
  0x40   :  { %p452_p10 = scmp.ne.s32.totalorder %s316_s23, %s451_s24  ;;  %p457_p12 = scmp.lt.s32.totalorder %s451_s24, %s451_s24 }
  0x41   :  { %165 = vmatpush1.bf16.msra.mxu0 %v364_v6 }
  0x42   :  { %166 = vmatprep.subr.bf16.mxu0 %v365_v7  ;;  %p458_p13 = por %p457_p12, %p456_p11 }
  0x44   :  { %p459_p0 = pnand %p458_p13, %p452_p10 }
  0x45   :  { %167 = vmatpush1.bf16.msra.mxu0 %v367_v8  ;;  %v260_v8 = vsub.s32 1, %v259_v4 }
  0x46   :  { %168 = vmatprep.subr.bf16.mxu0 %v368_v9  ;;  %v73_v9 = vld [vmem:[#allocation7] sm:$0x77] }
  0x49   :  { %169 = vmatpush1.bf16.msra.mxu0 %v370_v10  ;;  %v264_v10 = vsub.s32 5, %v259_v4 }
  0x4a   :  { %170 = vmatprep.subr.bf16.mxu0 %v371_v11  ;;  %v282_v11 = vsub.s32 2, %v259_v4 }
  0x4d   :  { %171 = vmatpush1.bf16.msra.mxu0 %v373_v12  ;;  %v286_v12 = vsub.s32 6, %v259_v4 }
  0x4e   :  { %172 = vmatprep.subr.bf16.mxu0 %v374_v13  ;;  %v261_v13 = vrot.slane %v73_v9, %v260_v8 }
  0x51   :  { %173 = vmatpush1.bf16.msra.mxu0 %v376_v14  ;;  %v265_v14 = vrot.slane %v73_v9, %v264_v10 }
  0x52   :  { %174 = vmatprep.subr.bf16.mxu0 %v377_v15  ;;  %v283_v15 = vrot.slane %v73_v9, %v282_v11 }
  0x55   :  { %175 = vmatpush1.bf16.msra.mxu0 %v379_v16  ;;  %v287_v16 = vrot.slane %v73_v9, %v286_v12 }
  0x58   :  { %193 = vmatmul.mubr.bf16.vlgmr.msra.gmra.mrb[0].mxu0 %v380_v17  ;;  %v271_v17 = vrot.slane %v261_v13, %v260_v8 }
 0x12b   :  { %v194_v18 = vpop.f32.mrb[0].mxu0 }
 0x12c   :  { %v196_v19 = vpop.f32.mrb[1].mxu0 }
 0x12d   :  { %v198_v20 = vpop.f32.mrb[2].mxu0 }
 0x12e   :  { %v203_v21 = vadd.f32 %v198_v20, %v194_v18  ;;  %v200_v22 = vpop.f32.mrb[3].mxu0 }
 0x12f   :  { %v210_v23 = vadd.f32 %v200_v22, %v196_v19 }
 0x130   :  { %v204_v24 = vrot.slane %v203_v21, 4 }
 0x131   :  { %v211_v25 = vrot.slane %v210_v23, 4 }
 0x132   :  { %v205_v26 = vadd.f32 %v204_v24, %v203_v21 }
 0x133   :  { %v212_v27 = vadd.f32 %v211_v25, %v210_v23  ;;  %v293_v23 = vrot.slane %v283_v15, %v282_v11 }
 0x134   :  { %v206_v28 = vrot.slane %v205_v26, 2 }
 0x135   :  { %v213_v29 = vrot.slane %v212_v27, 2 }
 0x136   :  { %v207_v30 = vadd.f32 %v206_v28, %v205_v26  ;;  %v297_v26 = vrot.slane %v287_v16, %v282_v11 }
 0x137   :  { %v214_v31 = vadd.f32 %v213_v29, %v212_v27 }
 0x138   :  { %v208_v32 = vrot.slane %v207_v30, 1 }
 0x139   :  { %v215_v33 = vrot.slane %v214_v31, 1 }
 0x13a   :  { %v209_v34 = vadd.f32 %v208_v32, %v207_v30 }
 0x13b   :  { %v216_v35 = vadd.f32 %v215_v33, %v214_v31 }
 0x13c   :  { %v217_v36 = vmul.f32 0.125, %v209_v34 }
 0x13d   :  { %v218_v37 = vmul.f32 0.125, %v216_v35 }
 0x13e   :  { %v219_v38 = vsub.f32 %v194_v18, %v217_v36  ;;  %v221_v39 = vsub.f32 %v198_v20, %v217_v36  ;;  %v241_v55 = vmul.f32 %v217_v36, %v217_v36 }
 0x13f   :  { %v220_v40 = vsub.f32 %v196_v19, %v218_v37  ;;  %v222_v41 = vsub.f32 %v200_v22, %v218_v37  ;;  %v242_v57 = vmul.f32 %v218_v37, %v218_v37  ;;  %v275_v19 = vrot.slane %v265_v14, %v260_v8 }
 0x140   :  { %v223_v42 = vmul.f32 %v219_v38, %v219_v38  ;;  %v225_v43 = vmul.f32 %v221_v39, %v221_v39  ;;  %v243_v61 = vmul.f32 8.0, %v241_v55 }
 0x141   :  { %v224_v44 = vmul.f32 %v220_v40, %v220_v40  ;;  %v226_v45 = vmul.f32 %v222_v41, %v222_v41  ;;  %v244_v0 = vmul.f32 8.0, %v242_v57 }
 0x142   :  { %v227_v46 = vadd.f32 %v225_v43, %v223_v42 }
 0x143   :  { %v234_v47 = vadd.f32 %v226_v45, %v224_v44 }
 0x144   :  { %v228_v48 = vrot.slane %v227_v46, 4 }
 0x145   :  { %v235_v49 = vrot.slane %v234_v47, 4 }
 0x146   :  { %v229_v50 = vadd.f32 %v228_v48, %v227_v46 }
 0x147   :  { %v236_v51 = vadd.f32 %v235_v49, %v234_v47 }
 0x148   :  { %v230_v52 = vrot.slane %v229_v50, 2 }
 0x149   :  { %v237_v53 = vrot.slane %v236_v51, 2 }
 0x14a   :  { %v231_v54 = vadd.f32 %v230_v52, %v229_v50 }
 0x14b   :  { %v238_v56 = vadd.f32 %v237_v53, %v236_v51 }
 0x14c   :  { %v232_v58 = vrot.slane %v231_v54, 1 }
 0x14d   :  { %v239_v59 = vrot.slane %v238_v56, 1 }
 0x14e   :  { %v233_v60 = vadd.f32 %v232_v58, %v231_v54 }
 0x14f   :  { %v240_v63 = vadd.f32 %v239_v59, %v238_v56 }
 0x150   :  { %v245_v1 = vsub.f32 %v233_v60, %v243_v61 }
 0x151   :  { %v246_v2 = vsub.f32 %v240_v63, %v244_v0 }
 0x152   :  { %v247_v3 = vmul.f32 0.125, %v245_v1 }
 0x153   :  { %v248_v5 = vmul.f32 0.125, %v246_v2 }
 0x154   :  { %v249_v6 = vadd.f32 1e-05, %v247_v3 }
 0x155   :  { %v250_v7 = vadd.f32 1e-05, %v248_v5 }
 0x156   :  { %381 = vrsqrt.f32 %v249_v6 }
 0x157   :  { %383 = vrsqrt.f32 %v250_v7 }
 0x160   :  { %v382_v18 = vpop.eup %381 }
 0x161   :  { %v384_v20 = vpop.eup %383  ;;  %v253_v21 = vmul.f32 %v382_v18, %v219_v38  ;;  %v255_v22 = vmul.f32 %v382_v18, %v221_v39 }
 0x162   :  { %v254_v24 = vmul.f32 %v384_v20, %v220_v40  ;;  %v256_v25 = vmul.f32 %v384_v20, %v222_v41 }
 0x163   :  { %v276_v27 = vmul.f32 %v271_v17, %v253_v21  ;;  %v278_v28 = vmul.f32 %v271_v17, %v255_v22 }
 0x164   :  { %v277_v29 = vmul.f32 %v275_v19, %v254_v24  ;;  %v279_v30 = vmul.f32 %v275_v19, %v256_v25 }
 0x165   :  { %v298_v31 = vadd.f32 %v293_v23, %v276_v27  ;;  %v300_v32 = vadd.f32 %v293_v23, %v278_v28 }
 0x166   :  { %v299_v33 = vadd.f32 %v297_v26, %v277_v29  ;;  %v301_v34 = vadd.f32 %v297_v26, %v279_v30 }
 0x167   :  { %v302_v35 = vmax.f32 %v298_v31, 0.0  ;;  %v304_v36 = vmax.f32 %v300_v32, 0.0 }
 0x168   :  { %v303_v37 = vmax.f32 %v299_v33, 0.0  ;;  %v305_v38 = vmax.f32 %v301_v34, 0.0 }
 0x169   :  { %306 = vst [vmem:[#allocation8] sm:$0xff] %v302_v35  ;;  %308 = vst [vmem:[#allocation8 + $0x10] sm:$0xff] %v304_v36 }
 0x16a   :  { %307 = vst [vmem:[#allocation8 + $0x8] sm:$0xff] %v303_v37  ;;  %309 = vst [vmem:[#allocation8 + $0x18] sm:$0xff] %v305_v38 }
 0x16b   :  { %462 = shalt.err (!%p459_p0)
}
 0x16c   :  { %s463_s27 = scalar_lea.hbm %s561_s3, 512 }
 0x16d   :  { %p464_p1 = scmp.ne.s32.totalorder %s561_s3, %s463_s27  ;;  %p467_p2 = scmp.lt.u32.totalorder %s463_s27, %s561_s3 }
 0x16f   :  { %p469_p3 = pnand %p467_p2, %p464_p1 }
 0x171   :  { %472 = shalt.err (!%p469_p3)
}
 0x172   :  { %s488_s5 = smov 256   ;;  %s489_s6 = smov 16  }
 0x173   :  { %321 = dma.vmem_to_hbm [thread:$0]  %s316_s23, 512, %s561_s3, [#allocation4], %s488_s5, %s488_s5, %s489_s6  }
 0x174   :  { %477 = dma.done.wait [#allocation4], 512  }
 0x175   :  { %478 = vsyncadd [#allocation4], 4294966784 }
 0x176   :  { %325 = vsyncpa [#allocation3], 1 }
 0x177   :  { %326 = vsyncpa [#allocation6], 1 }
 0x178   :  { %327 = vsyncpa [#allocation4], 1 }

</bundles_post_ra>
